<compile_context>
chip_gen: v7x
topology: tpu7x:2x2x1
jax: 0.10.0
libtpu: 0.0.40
codegen_flags: <defaults>
</compile_context>

<pallas_src>
import functools

import jax
import jax.numpy as jnp
from jax.experimental import pallas as pl
from jax.experimental.pallas import tpu as pltpu


def _round_up(x, m):
    return (x + m - 1) // m * m


@functools.lru_cache(maxsize=None)
def _vmem_budget_bytes():
    """Per-generation usable VMEM budget (physical capacity minus headroom)."""
    cap = 0
    try:
        cap = int(getattr(pltpu.get_tpu_info(), "vmem_capacity_bytes", 0) or 0)
    except Exception:
        cap = 0
    if cap <= 0:
        cap = 64 << 20  # conservative default == v7x per-TensorCore VMEM
    return max(cap - (8 << 20), 24 << 20)


def _const_block_spec(shape, single_buffer):
    """Whole-array block with constant index_map (stays VMEM-resident across batch tiles).

    Weights never change between grid steps, so double-buffering them is pure VMEM waste:
    request single buffering when this jax version supports pipeline_mode=pl.Buffered(1).
    """
    if single_buffer:
        try:
            return pl.BlockSpec(shape, lambda i: (0, 0), pipeline_mode=pl.Buffered(1))
        except Exception:
            pass
    return pl.BlockSpec(shape, lambda i: (0, 0))


def _choose_tile_b(batch, fits):
    """Largest batch tile that fits VMEM with <=~15% batch-padding waste; ensure >=2 grid
    steps for mid/large batches so dual-TC chips (v7x) can shard the 'parallel' axis."""
    b8 = _round_up(max(batch, 1), 8)
    candidates = [tb for tb in (2048, 1024, 512, 256, 128, 64, 32, 16, 8) if tb <= b8]
    if not candidates:
        candidates = [b8]
    max_waste = max(int(0.15 * batch), 8)
    tile_b = None
    for tb in candidates:
        if fits(tb) and (_round_up(batch, tb) - batch) <= max_waste:
            tile_b = tb
            break
    if tile_b is None:
        fitting = [tb for tb in candidates if fits(tb)]
        tile_b = min(fitting) if fitting else candidates[-1]
    if b8 > 256 and _round_up(batch, tile_b) // tile_b < 2:
        tile_b = _round_up((batch + 1) // 2, 8)   # split across both TensorCores
    return tile_b


def _make_fused_mlp_kernel(n_layers, compute_dtype):
    """Kernel body: chained (x @ W + b) -> ReLU for all layers, fully VMEM/vreg-resident."""

    def kernel(*refs):
        # refs = (x_ref, w0, b0, w1, b1, ..., o_ref)
        x_ref = refs[0]
        o_ref = refs[-1]
        h = x_ref[...]
        if h.dtype != compute_dtype:
            h = h.astype(compute_dtype)
        for l in range(n_layers):
            w = refs[1 + 2 * l][...]
            b = refs[2 + 2 * l][...]
            if w.dtype != compute_dtype:
                w = w.astype(compute_dtype)
            # MXU matmul with f32 accumulation; bias + ReLU on the VPU in f32.
            y = jnp.dot(h, w, preferred_element_type=jnp.float32)
            h = jnp.maximum(y + b.astype(jnp.float32), 0.0)
            if l < n_layers - 1:
                # Keep inter-layer activations in compute_dtype (bf16 path halves vreg/VMEM
                # pressure; no-op for f32 compute).
                h = h.astype(compute_dtype)
        o_ref[...] = h.astype(o_ref.dtype)

    return kernel


def init_dnn_params(key, inputs_dim, hidden_units, init_std=1e-4):
    """Mirror DNN.__init__: nn.Linear(in, out) per layer; weights stored as (in, out)."""
    dims = [inputs_dim] + list(hidden_units)
    params = []
    for i in range(len(dims) - 1):
        din, dout = dims[i], dims[i + 1]
        key, kw, kb = jax.random.split(key, 3)
        w = init_std * jax.random.normal(kw, (din, dout), dtype=jnp.float32)
        bound = 1.0 / (din ** 0.5)
        b = jax.random.uniform(kb, (dout,), dtype=jnp.float32, minval=-bound, maxval=bound)
        params.append((w, b))
    return params


def pad_dnn_params(params, param_dtype=jnp.bfloat16):
    """Prepare (W, b) for the fused kernel.

    * Only the FINAL layer's output dim is zero-padded to a multiple of 128 (lane-dense,
      unmasked stores of the kernel output).  Contraction (K) dims and intermediate hidden
      widths are left unpadded: activations never leave VMEM, and padding K is extra MXU work.
    * Params are stored in `param_dtype` (bf16 by default): halves weight DMA bytes and
      resident VMEM and removes per-layer casts inside the kernel.
    Zero-padding the last layer is exact (padded output columns are sliced away by the wrapper).
    """
    n = len(params)
    padded = []
    for i, (w, b) in enumerate(params):
        din, dout = w.shape
        dout_s = _round_up(dout, 128) if i == n - 1 else dout
        w_p = jnp.zeros((din, dout_s), param_dtype).at[:, :dout].set(w.astype(param_dtype))
        b_p = jnp.zeros((1, dout_s), param_dtype).at[0, :dout].set(b.astype(param_dtype))
        padded.append((w_p, b_p))
    return tuple(padded)


@functools.partial(
    jax.jit,
    static_argnames=("in_dim", "out_dim", "compute_dtype", "single_buffer_weights"))
def _dnn_forward_impl(x, padded_params, *, in_dim, out_dim, compute_dtype,
                      single_buffer_weights):
    n_layers = len(padded_params)
    lead_shape = x.shape[:-1]
    x2 = x.reshape(-1, in_dim)
    batch = x2.shape[0]
    dout_pad = padded_params[-1][0].shape[1]

    x_itemsize = jnp.dtype(compute_dtype).itemsize
    out_itemsize = 4
    param_bytes = sum(int(w.size) * w.dtype.itemsize + int(b.size) * b.dtype.itemsize
                      for w, b in padded_params)
    weight_buf = 1 if single_buffer_weights else 2
    max_width = max([in_dim] + [w.shape[1] for w, _ in padded_params])
    budget = _vmem_budget_bytes()

    def fits(tb):
        stream = 2 * tb * (in_dim * x_itemsize + dout_pad * out_itemsize)  # dbl-buffered x/out
        act = 2 * tb * max_width * 4                                       # f32 activation room
        return weight_buf * param_bytes + stream + act + (2 << 20) <= budget

    # TODO(synk): if the resident (single-buffered) weights alone exceed the VMEM budget
    # (e.g. a 4096x4096 f32 layer on v7x), stream weights per layer via pltpu.emit_pipeline /
    # an extra grid axis instead of relying on a huge scoped-VMEM limit.
    tile_b = _choose_tile_b(batch, fits)
    b_pad = _round_up(batch, tile_b)

    # Stream x in compute_dtype (halves the only per-step HBM input stream on the bf16 path).
    x_p = jnp.zeros((b_pad, in_dim), compute_dtype).at[:batch, :].set(x2.astype(compute_dtype))

    grid = (b_pad // tile_b,)
    in_specs = [pl.BlockSpec((tile_b, in_dim), lambda i: (i, 0))]
    flat_params = []
    for w, b in padded_params:
        in_specs.append(_const_block_spec(w.shape, single_buffer_weights))
        in_specs.append(_const_block_spec(b.shape, single_buffer_weights))
        flat_params.extend([w, b])
    out_spec = pl.BlockSpec((tile_b, dout_pad), lambda i: (i, 0))

    # Advisory cost estimate for XLA's scheduler.
    flops = sum(2 * b_pad * w.shape[0] * w.shape[1] for w, _ in padded_params)
    bytes_accessed = (int(x_p.size) * x_itemsize + param_bytes + b_pad * dout_pad * out_itemsize)
    cost = pl.CostEstimate(flops=int(flops), transcendentals=0,
                           bytes_accessed=int(bytes_accessed))

    out_pad = pl.pallas_call(
        _make_fused_mlp_kernel(n_layers, compute_dtype),
        out_shape=jax.ShapeDtypeStruct((b_pad, dout_pad), jnp.float32),
        grid=grid,
        in_specs=in_specs,
        out_specs=out_spec,
        compiler_params=pltpu.CompilerParams(
            dimension_semantics=("parallel",),
            vmem_limit_bytes=int(budget),
        ),
        cost_estimate=cost,
    )(x_p, *flat_params)

    out = out_pad[:batch, :out_dim]
    return out.reshape(lead_shape + (out_dim,))


def dnn_forward(x, padded_params, *, in_dim, out_dim, compute_dtype=jnp.float32):
    """DNN.forward (inference): sequential Linear -> ReLU (dropout_rate=0, use_bn=False),
    fused into a single Pallas launch.  x: (..., in_dim) f32 -> (..., out_dim) f32."""
    kwargs = dict(in_dim=in_dim, out_dim=out_dim, compute_dtype=compute_dtype)
    try:
        return _dnn_forward_impl(x, padded_params, single_buffer_weights=True, **kwargs)
    except Exception:
        # Single-buffered weight BlockSpecs unsupported on this jax build -> plain specs.
        return _dnn_forward_impl(x, padded_params, single_buffer_weights=False, **kwargs)


if __name__ == "__main__":
    # Small shapes consistent with the module: 2D input (batch, inputs_dim).
    batch = 8
    inputs_dim = 32
    hidden_units = (64, 32, 16)

    key = jax.random.PRNGKey(0)
    key, kx = jax.random.split(key)
    x = jax.random.normal(kx, (batch, inputs_dim), dtype=jnp.float32)
    params = init_dnn_params(key, inputs_dim, hidden_units, init_std=1e-4)

    # Pure-JAX reference of the same math (Linear -> ReLU chain, unpadded f32 params).
    ref = x
    for w, b in params:
        ref = jnp.maximum(ref @ w + b, 0.0)

    # 1) f32 weights + f32 compute: tight numerical check of the fused kernel.
    params_f32 = pad_dnn_params(params, param_dtype=jnp.float32)
    out_f32 = dnn_forward(x, params_f32, in_dim=inputs_dim, out_dim=hidden_units[-1],
                          compute_dtype=jnp.float32)
    out_f32 = jax.block_until_ready(out_f32)
    assert out_f32.shape == (batch, hidden_units[-1]), out_f32.shape
    assert out_f32.dtype == jnp.float32
    assert jnp.allclose(out_f32, ref, atol=1e-5, rtol=1e-5)

    # 2) bf16 weights + bf16 activations (production path on v5e/v6e/v7x; f32 accumulation).
    params_bf16 = pad_dnn_params(params, param_dtype=jnp.bfloat16)
    out_bf16 = dnn_forward(x, params_bf16, in_dim=inputs_dim, out_dim=hidden_units[-1],
                           compute_dtype=jnp.bfloat16)
    out_bf16 = jax.block_until_ready(out_bf16)
    assert out_bf16.shape == (batch, hidden_units[-1])
    assert out_bf16.dtype == jnp.float32
    assert jnp.allclose(out_bf16, ref, atol=2e-2, rtol=2e-2)

    # 3) Batch not a multiple of the tile exercises the batch-padding / remainder path.
    xb = jax.random.normal(jax.random.PRNGKey(1), (20, inputs_dim), dtype=jnp.float32)
    refb = xb
    for w, b in params:
        refb = jnp.maximum(refb @ w + b, 0.0)
    out_b = dnn_forward(xb, params_f32, in_dim=inputs_dim, out_dim=hidden_units[-1],
                        compute_dtype=jnp.float32)
    out_b = jax.block_until_ready(out_b)
    assert out_b.shape == (20, hidden_units[-1])
    assert jnp.allclose(out_b, refb, atol=1e-5, rtol=1e-5)

    print("KERNEL_OK")
</pallas_src>

<mosaic_0001>
module attributes {stable_mosaic.version = 11 : i64} {
  func.func @kernel(%arg0: i32, %arg1: memref<8x32xf32, #tpu.memory_space<vmem>>, %arg2: memref<32x64xf32, #tpu.memory_space<vmem>>, %arg3: memref<1x64xf32, #tpu.memory_space<vmem>>, %arg4: memref<64x32xf32, #tpu.memory_space<vmem>>, %arg5: memref<1x32xf32, #tpu.memory_space<vmem>>, %arg6: memref<32x128xf32, #tpu.memory_space<vmem>>, %arg7: memref<1x128xf32, #tpu.memory_space<vmem>>, %arg8: memref<8x128xf32, #tpu.memory_space<vmem>>) attributes {dimension_semantics = [#tpu.dimension_semantics<parallel>], iteration_bounds = array<i64: 1>, scalar_prefetch = 0 : i64, scratch_operands = 0 : i64, tpu.core_type = #tpu.core_type<tc>, window_params = [{transform_indices = @transform_0, window_bounds = array<i64: 8, 32>}, {pipeline_mode = #tpu.pipeline_mode<synchronous>, transform_indices = @transform_1, window_bounds = array<i64: 32, 64>}, {pipeline_mode = #tpu.pipeline_mode<synchronous>, transform_indices = @transform_2, window_bounds = array<i64: 1, 64>}, {pipeline_mode = #tpu.pipeline_mode<synchronous>, transform_indices = @transform_3, window_bounds = array<i64: 64, 32>}, {pipeline_mode = #tpu.pipeline_mode<synchronous>, transform_indices = @transform_4, window_bounds = array<i64: 1, 32>}, {pipeline_mode = #tpu.pipeline_mode<synchronous>, transform_indices = @transform_5, window_bounds = array<i64: 32, 128>}, {pipeline_mode = #tpu.pipeline_mode<synchronous>, transform_indices = @transform_6, window_bounds = array<i64: 1, 128>}, {transform_indices = @transform_7, window_bounds = array<i64: 8, 128>}]} {
    %c0 = arith.constant 0 : index
    %c0_0 = arith.constant 0 : index
    %0 = vector.load %arg1[%c0, %c0_0] : memref<8x32xf32, #tpu.memory_space<vmem>>, vector<8x32xf32>
    %c0_1 = arith.constant 0 : index
    %c0_2 = arith.constant 0 : index
    %1 = vector.load %arg2[%c0_1, %c0_2] : memref<32x64xf32, #tpu.memory_space<vmem>>, vector<32x64xf32>
    %c0_3 = arith.constant 0 : index
    %c0_4 = arith.constant 0 : index
    %2 = vector.load %arg3[%c0_3, %c0_4] : memref<1x64xf32, #tpu.memory_space<vmem>>, vector<1x64xf32>
    %cst = arith.constant dense<0.000000e+00> : vector<8x64xf32>
    %3 = tpu.matmul %0, %1, %cst {dimension_numbers = #tpu.dot_dimension_numbers<[1], [0], [0], [1], [0, 0, 1, 1], [], []>} : vector<8x32xf32>, vector<32x64xf32>, vector<8x64xf32> -> vector<8x64xf32>
    %4 = vector.broadcast %2 : vector<1x64xf32> to vector<8x64xf32>
    %5 = arith.addf %3, %4 : vector<8x64xf32>
    %cst_5 = arith.constant 0.000000e+00 : f32
    %6 = vector.broadcast %cst_5 : f32 to vector<8x64xf32>
    %7 = arith.maximumf %5, %6 : vector<8x64xf32>
    %c0_6 = arith.constant 0 : index
    %c0_7 = arith.constant 0 : index
    %8 = vector.load %arg4[%c0_6, %c0_7] : memref<64x32xf32, #tpu.memory_space<vmem>>, vector<64x32xf32>
    %c0_8 = arith.constant 0 : index
    %c0_9 = arith.constant 0 : index
    %9 = vector.load %arg5[%c0_8, %c0_9] : memref<1x32xf32, #tpu.memory_space<vmem>>, vector<1x32xf32>
    %cst_10 = arith.constant dense<0.000000e+00> : vector<8x32xf32>
    %10 = tpu.matmul %7, %8, %cst_10 {dimension_numbers = #tpu.dot_dimension_numbers<[1], [0], [0], [1], [0, 0, 1, 1], [], []>} : vector<8x64xf32>, vector<64x32xf32>, vector<8x32xf32> -> vector<8x32xf32>
    %11 = vector.broadcast %9 : vector<1x32xf32> to vector<8x32xf32>
    %12 = arith.addf %10, %11 : vector<8x32xf32>
    %cst_11 = arith.constant 0.000000e+00 : f32
    %13 = vector.broadcast %cst_11 : f32 to vector<8x32xf32>
    %14 = arith.maximumf %12, %13 : vector<8x32xf32>
    %c0_12 = arith.constant 0 : index
    %c0_13 = arith.constant 0 : index
    %15 = vector.load %arg6[%c0_12, %c0_13] : memref<32x128xf32, #tpu.memory_space<vmem>>, vector<32x128xf32>
    %c0_14 = arith.constant 0 : index
    %c0_15 = arith.constant 0 : index
    %16 = vector.load %arg7[%c0_14, %c0_15] : memref<1x128xf32, #tpu.memory_space<vmem>>, vector<1x128xf32>
    %cst_16 = arith.constant dense<0.000000e+00> : vector<8x128xf32>
    %17 = tpu.matmul %14, %15, %cst_16 {dimension_numbers = #tpu.dot_dimension_numbers<[1], [0], [0], [1], [0, 0, 1, 1], [], []>} : vector<8x32xf32>, vector<32x128xf32>, vector<8x128xf32> -> vector<8x128xf32>
    %18 = vector.broadcast %16 : vector<1x128xf32> to vector<8x128xf32>
    %19 = arith.addf %17, %18 : vector<8x128xf32>
    %cst_17 = arith.constant 0.000000e+00 : f32
    %20 = vector.broadcast %cst_17 : f32 to vector<8x128xf32>
    %21 = arith.maximumf %19, %20 : vector<8x128xf32>
    %c0_18 = arith.constant 0 : index
    %c0_19 = arith.constant 0 : index
    %22 = vector.load %arg8[%c0_18, %c0_19] : memref<8x128xf32, #tpu.memory_space<vmem>>, vector<8x128xf32>
    tpu.vector_store %arg8[%c0_18, %c0_19], %21 {strides = array<i32>} : memref<8x128xf32, #tpu.memory_space<vmem>>, vector<8x128xf32>,
    return
  }
  func.func @transform_0(%arg0: i32) -> (i32, i32) {
    %c0_i32 = arith.constant 0 : i32
    %c0_i32_0 = arith.constant 0 : i32
    return %arg0, %c0_i32 : i32, i32
  }
  func.func @transform_1(%arg0: i32) -> (i32, i32) {
    %c0_i32 = arith.constant 0 : i32
    %c0_i32_0 = arith.constant 0 : i32
    %c0_i32_1 = arith.constant 0 : i32
    return %c0_i32, %c0_i32_0 : i32, i32
  }
  func.func @transform_2(%arg0: i32) -> (i32, i32) {
    %c0_i32 = arith.constant 0 : i32
    %c0_i32_0 = arith.constant 0 : i32
    %c0_i32_1 = arith.constant 0 : i32
    return %c0_i32, %c0_i32_0 : i32, i32
  }
  func.func @transform_3(%arg0: i32) -> (i32, i32) {
    %c0_i32 = arith.constant 0 : i32
    %c0_i32_0 = arith.constant 0 : i32
    %c0_i32_1 = arith.constant 0 : i32
    return %c0_i32, %c0_i32_0 : i32, i32
  }
  func.func @transform_4(%arg0: i32) -> (i32, i32) {
    %c0_i32 = arith.constant 0 : i32
    %c0_i32_0 = arith.constant 0 : i32
    %c0_i32_1 = arith.constant 0 : i32
    return %c0_i32, %c0_i32_0 : i32, i32
  }
  func.func @transform_5(%arg0: i32) -> (i32, i32) {
    %c0_i32 = arith.constant 0 : i32
    %c0_i32_0 = arith.constant 0 : i32
    %c0_i32_1 = arith.constant 0 : i32
    return %c0_i32, %c0_i32_0 : i32, i32
  }
  func.func @transform_6(%arg0: i32) -> (i32, i32) {
    %c0_i32 = arith.constant 0 : i32
    %c0_i32_0 = arith.constant 0 : i32
    %c0_i32_1 = arith.constant 0 : i32
    return %c0_i32, %c0_i32_0 : i32, i32
  }
  func.func @transform_7(%arg0: i32) -> (i32, i32) {
    %c0_i32 = arith.constant 0 : i32
    %c0_i32_0 = arith.constant 0 : i32
    return %arg0, %c0_i32 : i32, i32
  }
}

module attributes {stable_mosaic.version = 11 : i64} {
  func.func @kernel(%arg0: i32, %arg1: memref<8x32xf32, #tpu.memory_space<vmem>>, %arg2: memref<32x64xf32, #tpu.memory_space<vmem>>, %arg3: memref<1x64xf32, #tpu.memory_space<vmem>>, %arg4: memref<64x32xf32, #tpu.memory_space<vmem>>, %arg5: memref<1x32xf32, #tpu.memory_space<vmem>>, %arg6: memref<32x128xf32, #tpu.memory_space<vmem>>, %arg7: memref<1x128xf32, #tpu.memory_space<vmem>>, %arg8: memref<8x128xf32, #tpu.memory_space<vmem>>) attributes {dimension_semantics = [#tpu.dimension_semantics<parallel>], iteration_bounds = array<i64: 1>, scalar_prefetch = 0 : i64, scratch_operands = 0 : i64, tpu.core_type = #tpu.core_type<tc>, window_params = [{transform_indices = @transform_0, window_bounds = array<i64: 8, 32>}, {pipeline_mode = #tpu.pipeline_mode<synchronous>, transform_indices = @transform_1, window_bounds = array<i64: 32, 64>}, {pipeline_mode = #tpu.pipeline_mode<synchronous>, transform_indices = @transform_2, window_bounds = array<i64: 1, 64>}, {pipeline_mode = #tpu.pipeline_mode<synchronous>, transform_indices = @transform_3, window_bounds = array<i64: 64, 32>}, {pipeline_mode = #tpu.pipeline_mode<synchronous>, transform_indices = @transform_4, window_bounds = array<i64: 1, 32>}, {pipeline_mode = #tpu.pipeline_mode<synchronous>, transform_indices = @transform_5, window_bounds = array<i64: 32, 128>}, {pipeline_mode = #tpu.pipeline_mode<synchronous>, transform_indices = @transform_6, window_bounds = array<i64: 1, 128>}, {transform_indices = @transform_7, window_bounds = array<i64: 8, 128>}]} {
    %c0 = arith.constant 0 : index
    %c0_0 = arith.constant 0 : index
    %0 = vector.load %arg1[%c0, %c0_0] : memref<8x32xf32, #tpu.memory_space<vmem>>, vector<8x32xf32>
    %c0_1 = arith.constant 0 : index
    %c0_2 = arith.constant 0 : index
    %1 = vector.load %arg2[%c0_1, %c0_2] : memref<32x64xf32, #tpu.memory_space<vmem>>, vector<32x64xf32>
    %c0_3 = arith.constant 0 : index
    %c0_4 = arith.constant 0 : index
    %2 = vector.load %arg3[%c0_3, %c0_4] : memref<1x64xf32, #tpu.memory_space<vmem>>, vector<1x64xf32>
    %cst = arith.constant dense<0.000000e+00> : vector<8x64xf32>
    %3 = tpu.matmul %0, %1, %cst {dimension_numbers = #tpu.dot_dimension_numbers<[1], [0], [0], [1], [0, 0, 1, 1], [], []>} : vector<8x32xf32>, vector<32x64xf32>, vector<8x64xf32> -> vector<8x64xf32>
    %4 = vector.broadcast %2 : vector<1x64xf32> to vector<8x64xf32>
    %5 = arith.addf %3, %4 : vector<8x64xf32>
    %cst_5 = arith.constant 0.000000e+00 : f32
    %6 = vector.broadcast %cst_5 : f32 to vector<8x64xf32>
    %7 = arith.maximumf %5, %6 : vector<8x64xf32>
    %c0_6 = arith.constant 0 : index
    %c0_7 = arith.constant 0 : index
    %8 = vector.load %arg4[%c0_6, %c0_7] : memref<64x32xf32, #tpu.memory_space<vmem>>, vector<64x32xf32>
    %c0_8 = arith.constant 0 : index
    %c0_9 = arith.constant 0 : index
    %9 = vector.load %arg5[%c0_8, %c0_9] : memref<1x32xf32, #tpu.memory_space<vmem>>, vector<1x32xf32>
    %cst_10 = arith.constant dense<0.000000e+00> : vector<8x32xf32>
    %10 = tpu.matmul %7, %8, %cst_10 {dimension_numbers = #tpu.dot_dimension_numbers<[1], [0], [0], [1], [0, 0, 1, 1], [], []>} : vector<8x64xf32>, vector<64x32xf32>, vector<8x32xf32> -> vector<8x32xf32>
    %11 = vector.broadcast %9 : vector<1x32xf32> to vector<8x32xf32>
    %12 = arith.addf %10, %11 : vector<8x32xf32>
    %cst_11 = arith.constant 0.000000e+00 : f32
    %13 = vector.broadcast %cst_11 : f32 to vector<8x32xf32>
    %14 = arith.maximumf %12, %13 : vector<8x32xf32>
    %c0_12 = arith.constant 0 : index
    %c0_13 = arith.constant 0 : index
    %15 = vector.load %arg6[%c0_12, %c0_13] : memref<32x128xf32, #tpu.memory_space<vmem>>, vector<32x128xf32>
    %c0_14 = arith.constant 0 : index
    %c0_15 = arith.constant 0 : index
    %16 = vector.load %arg7[%c0_14, %c0_15] : memref<1x128xf32, #tpu.memory_space<vmem>>, vector<1x128xf32>
    %cst_16 = arith.constant dense<0.000000e+00> : vector<8x128xf32>
    %17 = tpu.matmul %14, %15, %cst_16 {dimension_numbers = #tpu.dot_dimension_numbers<[1], [0], [0], [1], [0, 0, 1, 1], [], []>} : vector<8x32xf32>, vector<32x128xf32>, vector<8x128xf32> -> vector<8x128xf32>
    %18 = vector.broadcast %16 : vector<1x128xf32> to vector<8x128xf32>
    %19 = arith.addf %17, %18 : vector<8x128xf32>
    %cst_17 = arith.constant 0.000000e+00 : f32
    %20 = vector.broadcast %cst_17 : f32 to vector<8x128xf32>
    %21 = arith.maximumf %19, %20 : vector<8x128xf32>
    %c0_18 = arith.constant 0 : index
    %c0_19 = arith.constant 0 : index
    %22 = vector.load %arg8[%c0_18, %c0_19] : memref<8x128xf32, #tpu.memory_space<vmem>>, vector<8x128xf32>
    tpu.vector_store %arg8[%c0_18, %c0_19], %21 {strides = array<i32>} : memref<8x128xf32, #tpu.memory_space<vmem>>, vector<8x128xf32>,
    return
  }
  func.func @transform_0(%arg0: i32) -> (i32, i32) {
    %c0_i32 = arith.constant 0 : i32
    %c0_i32_0 = arith.constant 0 : i32
    return %arg0, %c0_i32 : i32, i32
  }
  func.func @transform_1(%arg0: i32) -> (i32, i32) {
    %c0_i32 = arith.constant 0 : i32
    %c0_i32_0 = arith.constant 0 : i32
    %c0_i32_1 = arith.constant 0 : i32
    return %c0_i32, %c0_i32_0 : i32, i32
  }
  func.func @transform_2(%arg0: i32) -> (i32, i32) {
    %c0_i32 = arith.constant 0 : i32
    %c0_i32_0 = arith.constant 0 : i32
    %c0_i32_1 = arith.constant 0 : i32
    return %c0_i32, %c0_i32_0 : i32, i32
  }
  func.func @transform_3(%arg0: i32) -> (i32, i32) {
    %c0_i32 = arith.constant 0 : i32
    %c0_i32_0 = arith.constant 0 : i32
    %c0_i32_1 = arith.constant 0 : i32
    return %c0_i32, %c0_i32_0 : i32, i32
  }
  func.func @transform_4(%arg0: i32) -> (i32, i32) {
    %c0_i32 = arith.constant 0 : i32
    %c0_i32_0 = arith.constant 0 : i32
    %c0_i32_1 = arith.constant 0 : i32
    return %c0_i32, %c0_i32_0 : i32, i32
  }
  func.func @transform_5(%arg0: i32) -> (i32, i32) {
    %c0_i32 = arith.constant 0 : i32
    %c0_i32_0 = arith.constant 0 : i32
    %c0_i32_1 = arith.constant 0 : i32
    return %c0_i32, %c0_i32_0 : i32, i32
  }
  func.func @transform_6(%arg0: i32) -> (i32, i32) {
    %c0_i32 = arith.constant 0 : i32
    %c0_i32_0 = arith.constant 0 : i32
    %c0_i32_1 = arith.constant 0 : i32
    return %c0_i32, %c0_i32_0 : i32, i32
  }
  func.func @transform_7(%arg0: i32) -> (i32, i32) {
    %c0_i32 = arith.constant 0 : i32
    %c0_i32_0 = arith.constant 0 : i32
    return %arg0, %c0_i32 : i32, i32
  }
}

</mosaic_0001>

<bundles_post_ra>
// kernel: _dnn_forward_impl.1
= control target key start
LH: loop header
LB: loop body
LE: loop exit
PB: predicated region body
PF: predicated region fallthrough
CT: control target
= control target key end

     0   :  { %v422_v3 = vmov 0.0|0.0   ;;  %vm423_vm0 = vmmov 0   ;;  %v424_v6 = vmov 0.0   ;;  %s543_s0 = inlined_call_operand.vmem [shape: f32[8,32], index: 0, kind: input, shape index: {}]   ;;  %s544_s1 = inlined_call_operand.vmem [shape: f32[32,64], index: 1, kind: input, shape index: {}]   ;;  %s545_s2 = inlined_call_operand.vmem [shape: f32[1,64], index: 2, kind: input, shape index: {}]   ;;  %s546_s3 = inlined_call_operand.vmem [shape: f32[64,32], index: 3, kind: input, shape index: {}]   ;;  %s547_s4 = inlined_call_operand.vmem [shape: f32[1,32], index: 4, kind: input, shape index: {}]   ;;  %s548_s5 = inlined_call_operand.vmem [shape: f32[32,128], index: 5, kind: input, shape index: {}]   ;;  %s549_s6 = inlined_call_operand.vmem [shape: f32[1,128], index: 6, kind: input, shape index: {}]   ;;  %s550_s7 = inlined_call_operand.hbm [shape: f32[8,128], index: 7, kind: output, shape index: {}]  }
   0x1   :  { %v28_v0 = vld [vmem:[%s544_s1] sm:$0xff]  ;;  %v29_v1 = vld [vmem:[%s544_s1 + $0x8] sm:$0xff]  ;;  %v30_v2 = vld [vmem:[%s544_s1 + $0x10] sm:$0xff]  ;;  %370 = vmatprep.subr.bf16.mxu0 %v422_v3  ;;  %337 = vmatprep.mubr.msk.f32.mxu0 %vm423_vm0, %v424_v6 }
   0x2   :  { %v371_v4 = vpack.c.bf16 %v29_v1, %v28_v0  ;;  %v31_v5 = vld [vmem:[%s544_s1 + $0x18] sm:$0xff]  ;;  %v114_v7 = vld [vmem:[%s546_s3] sm:$0xff]  ;;  %376 = vmatprep.subr.bf16.mxu1 %v422_v3  ;;  %v115_v8 = vld [vmem:[%s546_s3 + $0x8] sm:$0xff]  ;;  %356 = vmatprep.mubr.msk.f32.mxu1 %vm423_vm0, %v424_v6 }
   0x3   :  { %v116_v9 = vld [vmem:[%s546_s3 + $0x10] sm:$0xff]  ;;  %v117_v10 = vld [vmem:[%s546_s3 + $0x18] sm:$0xff]  ;;  %v374_v11 = vpack.c.bf16 %v31_v5, %v30_v2  ;;  %v377_v12 = vpack.c.bf16 %v115_v8, %v114_v7 }
   0x4   :  { %372 = vmatpush3.bf16.msra.mxu0 %v371_v4 }
   0x5   :  { %373 = vmatprep.subr.bf16.mxu0 %v422_v3 }
   0x6   :  { %12 = vsyncpa [#allocation3], 0  ;;  %378 = vmatpush3.bf16.msra.mxu1 %v377_v12  ;;  %v380_v13 = vpack.c.bf16 %v117_v10, %v116_v9  ;;  %v118_v14 = vld [vmem:[%s546_s3 + $0x20] sm:$0xff]  ;;  %v119_v15 = vld [vmem:[%s546_s3 + $0x28] sm:$0xff]  ;;  %vm39_vm1 = vcmask 261120   ;;  %vm129_vm2 = vcmask 523264  }
   0x7   :  { %379 = vmatprep.subr.bf16.mxu1 %v422_v3  ;;  %v27_v16 = vld [vmem:[%s543_s0] sm:$0xff]  ;;  %v383_v17 = vpack.c.bf16 %v119_v15, %v118_v14  ;;  %v120_v18 = vld [vmem:[%s546_s3 + $0x30] sm:$0xff]  ;;  %v121_v19 = vld [vmem:[%s546_s3 + $0x38] sm:$0xff]  ;;  %s425_s14 = smov [#allocation2]  }
   0x8   :  { %375 = vmatpush3.bf16.msra.mxu0 %v374_v11  ;;  %v386_v20 = vpack.c.bf16 %v121_v19, %v120_v18  ;;  %v204_v21 = vld [vmem:[%s548_s5] sm:$0xff]  ;;  %v205_v22 = vld [vmem:[%s548_s5 + $0x8] sm:$0xff]  ;;  %v206_v29 = vld [vmem:[%s548_s5 + $0x10] sm:$0xff]  ;;  %s296_s15 = sshll.u32 %s425_s14, 4  ;;  %s297_s15 = int_to_ptr.vmem [resolvable:$true] %s296_s15 }
   0x9   :  { %388 = vmatprep.subr.bf16.mxu0 %v422_v3  ;;  %v389_v23 = vpack.c.bf16 %v205_v22, %v204_v21  ;;  %v304_v24 = vld [vmem:[%s545_s2] ss:$0 sm:$0xff]  ;;  %v207_v30 = vld [vmem:[%s548_s5 + $0x18] sm:$0xff]  ;;  %s398_s5 = scalar_lea.vmem %s297_s15, 128  ;;  %p403_p1 = scmp.lt.s32.totalorder %s297_s15, %s297_s15 }
   0xa   :  { %381 = vmatpush3.bf16.msra.mxu1 %v380_v13  ;;  %v392_v31 = vpack.c.bf16 %v207_v30, %v206_v29  ;;  %v306_v32 = vld [vmem:[%s547_s4] ss:$0 sm:$0xff]  ;;  %p399_p0 = scmp.ne.s32.totalorder %s297_s15, %s398_s5  ;;  %p404_p2 = scmp.lt.s32.totalorder %s398_s5, %s398_s5 }
   0xb   :  { %338 = vmatmul.mubr.msk.f32.vlgmr.msra.gmra.mrb[0].mxu0 %vm39_vm1, %v27_v16  ;;  %382 = vmatprep.subr.bf16.mxu1 %v422_v3  ;;  %v308_v37 = vld [vmem:[%s549_s6] ss:$0 sm:$0xff] }
   0xc   :  { %367 = vmatprep.mubr.msk.f32.mxu0 %vm423_vm0, %v424_v6  ;;  %390 = vmatpush3.bf16.msra.mxu0 %v389_v23  ;;  %p405_p3 = por %p404_p2, %p403_p1 }
   0xd   :  { %391 = vmatprep.subr.bf16.mxu0 %v422_v3 }
   0xe   :  { %384 = vmatpush3.bf16.msra.mxu1 %v383_v17  ;;  %p406_p4 = pnand %p405_p3, %p399_p0 }
   0xf   :  { %385 = vmatprep.subr.bf16.mxu1 %v422_v3 }
  0x10   :  { %393 = vmatpush3.bf16.msra.mxu0 %v392_v31 }
  0x12   :  { %387 = vmatpush3.bf16.msra.mxu1 %v386_v20 }
  0xde   :  { %v109_v25 = vpop.f32.mrb[0].mxu0 }
  0xdf   :  { %v110_v26 = vadd.f32 %v304_v24, %v109_v25  ;;  %v339_v27 = vpop.f32.mrb[1].mxu0 }
  0xe1   :  { %v113_v28 = vmax.f32 %v110_v26, 0.0 }
  0xe3   :  { %357 = vmatmul.mubr.msk.f32.vlgmr.msra.gmra.mrb[0].mxu1 %vm129_vm2, %v113_v28 }
 0x1b6   :  { %v199_v33 = vpop.f32.mrb[0].mxu1 }
 0x1b7   :  { %v200_v34 = vadd.f32 %v306_v32, %v199_v33  ;;  %v358_v35 = vpop.f32.mrb[1].mxu1 }
 0x1b9   :  { %v203_v36 = vmax.f32 %v200_v34, 0.0 }
 0x1bb   :  { %368 = vmatmul.mubr.msk.f32.vlgmr.msra.gmra.mrb[2].mxu0 %vm39_vm1, %v203_v36 }
 0x28e   :  { %v284_v38 = vpop.f32.mrb[2].mxu0 }
 0x28f   :  { %v285_v39 = vadd.f32 %v308_v37, %v284_v38  ;;  %v369_v40 = vpop.f32.mrb[3].mxu0 }
 0x291   :  { %v288_v41 = vmax.f32 %v285_v39, 0.0 }
 0x293   :  { %289 = vst [vmem:[#allocation2] sm:$0xff] %v288_v41 }
 0x294   :  { %409 = shalt.err (!%p406_p4)
}
 0x295   :  { %s410_s1 = scalar_lea.hbm %s550_s7, 128 }
 0x296   :  { %p411_p5 = scmp.ne.s32.totalorder %s550_s7, %s410_s1  ;;  %p414_p6 = scmp.lt.u32.totalorder %s410_s1, %s550_s7 }
 0x298   :  { %p416_p7 = pnand %p414_p6, %p411_p5 }
 0x29a   :  { %419 = shalt.err (!%p416_p7)
}
 0x29b   :  { %299 = dma.vmem_to_hbm [thread:$0]  %s297_s15, 128, %s550_s7, [#allocation3]  }
 0x29c   :  { %420 = dma.done.wait [#allocation3], 128  }
 0x29d   :  { %421 = vsyncadd [#allocation3], 4294967168 }
 0x29e   :  { %303 = vsyncpa [#allocation3], 1 }

// kernel: _dnn_forward_impl.1
= control target key start
LH: loop header
LB: loop body
LE: loop exit
PB: predicated region body
PF: predicated region fallthrough
CT: control target
= control target key end

     0   :  { %v422_v3 = vmov 0.0|0.0   ;;  %vm423_vm0 = vmmov 0   ;;  %v424_v6 = vmov 0.0   ;;  %s543_s0 = inlined_call_operand.vmem [shape: f32[8,32], index: 0, kind: input, shape index: {}]   ;;  %s544_s1 = inlined_call_operand.vmem [shape: f32[32,64], index: 1, kind: input, shape index: {}]   ;;  %s545_s2 = inlined_call_operand.vmem [shape: f32[1,64], index: 2, kind: input, shape index: {}]   ;;  %s546_s3 = inlined_call_operand.vmem [shape: f32[64,32], index: 3, kind: input, shape index: {}]   ;;  %s547_s4 = inlined_call_operand.vmem [shape: f32[1,32], index: 4, kind: input, shape index: {}]   ;;  %s548_s5 = inlined_call_operand.vmem [shape: f32[32,128], index: 5, kind: input, shape index: {}]   ;;  %s549_s6 = inlined_call_operand.vmem [shape: f32[1,128], index: 6, kind: input, shape index: {}]   ;;  %s550_s7 = inlined_call_operand.hbm [shape: f32[8,128], index: 7, kind: output, shape index: {}]  }
   0x1   :  { %v28_v0 = vld [vmem:[%s544_s1] sm:$0xff]  ;;  %v29_v1 = vld [vmem:[%s544_s1 + $0x8] sm:$0xff]  ;;  %v30_v2 = vld [vmem:[%s544_s1 + $0x10] sm:$0xff]  ;;  %370 = vmatprep.subr.bf16.mxu0 %v422_v3  ;;  %337 = vmatprep.mubr.msk.f32.mxu0 %vm423_vm0, %v424_v6 }
   0x2   :  { %v371_v4 = vpack.c.bf16 %v29_v1, %v28_v0  ;;  %v31_v5 = vld [vmem:[%s544_s1 + $0x18] sm:$0xff]  ;;  %v114_v7 = vld [vmem:[%s546_s3] sm:$0xff]  ;;  %376 = vmatprep.subr.bf16.mxu1 %v422_v3  ;;  %v115_v8 = vld [vmem:[%s546_s3 + $0x8] sm:$0xff]  ;;  %356 = vmatprep.mubr.msk.f32.mxu1 %vm423_vm0, %v424_v6 }
   0x3   :  { %v116_v9 = vld [vmem:[%s546_s3 + $0x10] sm:$0xff]  ;;  %v117_v10 = vld [vmem:[%s546_s3 + $0x18] sm:$0xff]  ;;  %v374_v11 = vpack.c.bf16 %v31_v5, %v30_v2  ;;  %v377_v12 = vpack.c.bf16 %v115_v8, %v114_v7 }
   0x4   :  { %372 = vmatpush3.bf16.msra.mxu0 %v371_v4 }
   0x5   :  { %373 = vmatprep.subr.bf16.mxu0 %v422_v3 }
   0x6   :  { %12 = vsyncpa [#allocation3], 0  ;;  %378 = vmatpush3.bf16.msra.mxu1 %v377_v12  ;;  %v380_v13 = vpack.c.bf16 %v117_v10, %v116_v9  ;;  %v118_v14 = vld [vmem:[%s546_s3 + $0x20] sm:$0xff]  ;;  %v119_v15 = vld [vmem:[%s546_s3 + $0x28] sm:$0xff]  ;;  %vm39_vm1 = vcmask 261120   ;;  %vm129_vm2 = vcmask 523264  }
   0x7   :  { %379 = vmatprep.subr.bf16.mxu1 %v422_v3  ;;  %v27_v16 = vld [vmem:[%s543_s0] sm:$0xff]  ;;  %v383_v17 = vpack.c.bf16 %v119_v15, %v118_v14  ;;  %v120_v18 = vld [vmem:[%s546_s3 + $0x30] sm:$0xff]  ;;  %v121_v19 = vld [vmem:[%s546_s3 + $0x38] sm:$0xff]  ;;  %s425_s14 = smov [#allocation2]  }
   0x8   :  { %375 = vmatpush3.bf16.msra.mxu0 %v374_v11  ;;  %v386_v20 = vpack.c.bf16 %v121_v19, %v120_v18  ;;  %v204_v21 = vld [vmem:[%s548_s5] sm:$0xff]  ;;  %v205_v22 = vld [vmem:[%s548_s5 + $0x8] sm:$0xff]  ;;  %v206_v29 = vld [vmem:[%s548_s5 + $0x10] sm:$0xff]  ;;  %s296_s15 = sshll.u32 %s425_s14, 4  ;;  %s297_s15 = int_to_ptr.vmem [resolvable:$true] %s296_s15 }
   0x9   :  { %388 = vmatprep.subr.bf16.mxu0 %v422_v3  ;;  %v389_v23 = vpack.c.bf16 %v205_v22, %v204_v21  ;;  %v304_v24 = vld [vmem:[%s545_s2] ss:$0 sm:$0xff]  ;;  %v207_v30 = vld [vmem:[%s548_s5 + $0x18] sm:$0xff]  ;;  %s398_s5 = scalar_lea.vmem %s297_s15, 128  ;;  %p403_p1 = scmp.lt.s32.totalorder %s297_s15, %s297_s15 }
   0xa   :  { %381 = vmatpush3.bf16.msra.mxu1 %v380_v13  ;;  %v392_v31 = vpack.c.bf16 %v207_v30, %v206_v29  ;;  %v306_v32 = vld [vmem:[%s547_s4] ss:$0 sm:$0xff]  ;;  %p399_p0 = scmp.ne.s32.totalorder %s297_s15, %s398_s5  ;;  %p404_p2 = scmp.lt.s32.totalorder %s398_s5, %s398_s5 }
   0xb   :  { %338 = vmatmul.mubr.msk.f32.vlgmr.msra.gmra.mrb[0].mxu0 %vm39_vm1, %v27_v16  ;;  %382 = vmatprep.subr.bf16.mxu1 %v422_v3  ;;  %v308_v37 = vld [vmem:[%s549_s6] ss:$0 sm:$0xff] }
   0xc   :  { %367 = vmatprep.mubr.msk.f32.mxu0 %vm423_vm0, %v424_v6  ;;  %390 = vmatpush3.bf16.msra.mxu0 %v389_v23  ;;  %p405_p3 = por %p404_p2, %p403_p1 }
   0xd   :  { %391 = vmatprep.subr.bf16.mxu0 %v422_v3 }
   0xe   :  { %384 = vmatpush3.bf16.msra.mxu1 %v383_v17  ;;  %p406_p4 = pnand %p405_p3, %p399_p0 }
   0xf   :  { %385 = vmatprep.subr.bf16.mxu1 %v422_v3 }
  0x10   :  { %393 = vmatpush3.bf16.msra.mxu0 %v392_v31 }
  0x12   :  { %387 = vmatpush3.bf16.msra.mxu1 %v386_v20 }
  0xde   :  { %v109_v25 = vpop.f32.mrb[0].mxu0 }
  0xdf   :  { %v110_v26 = vadd.f32 %v304_v24, %v109_v25  ;;  %v339_v27 = vpop.f32.mrb[1].mxu0 }
  0xe1   :  { %v113_v28 = vmax.f32 %v110_v26, 0.0 }
  0xe3   :  { %357 = vmatmul.mubr.msk.f32.vlgmr.msra.gmra.mrb[0].mxu1 %vm129_vm2, %v113_v28 }
 0x1b6   :  { %v199_v33 = vpop.f32.mrb[0].mxu1 }
 0x1b7   :  { %v200_v34 = vadd.f32 %v306_v32, %v199_v33  ;;  %v358_v35 = vpop.f32.mrb[1].mxu1 }
 0x1b9   :  { %v203_v36 = vmax.f32 %v200_v34, 0.0 }
 0x1bb   :  { %368 = vmatmul.mubr.msk.f32.vlgmr.msra.gmra.mrb[2].mxu0 %vm39_vm1, %v203_v36 }
 0x28e   :  { %v284_v38 = vpop.f32.mrb[2].mxu0 }
 0x28f   :  { %v285_v39 = vadd.f32 %v308_v37, %v284_v38  ;;  %v369_v40 = vpop.f32.mrb[3].mxu0 }
 0x291   :  { %v288_v41 = vmax.f32 %v285_v39, 0.0 }
 0x293   :  { %289 = vst [vmem:[#allocation2] sm:$0xff] %v288_v41 }
 0x294   :  { %409 = shalt.err (!%p406_p4)
}
 0x295   :  { %s410_s1 = scalar_lea.hbm %s550_s7, 128 }
 0x296   :  { %p411_p5 = scmp.ne.s32.totalorder %s550_s7, %s410_s1  ;;  %p414_p6 = scmp.lt.u32.totalorder %s410_s1, %s550_s7 }
 0x298   :  { %p416_p7 = pnand %p414_p6, %p411_p5 }
 0x29a   :  { %419 = shalt.err (!%p416_p7)
}
 0x29b   :  { %299 = dma.vmem_to_hbm [thread:$0]  %s297_s15, 128, %s550_s7, [#allocation3]  }
 0x29c   :  { %420 = dma.done.wait [#allocation3], 128  }
 0x29d   :  { %421 = vsyncadd [#allocation3], 4294967168 }
 0x29e   :  { %303 = vsyncpa [#allocation3], 1 }

</bundles_post_ra>
